<compile_context>
chip_gen: v7x
topology: tpu7x:2x2x1
jax: 0.10.0
libtpu: 0.0.40
codegen_flags: <defaults>
</compile_context>

<pallas_src>
import functools

import jax
import jax.numpy as jnp
from jax.experimental import pallas as pl
from jax.experimental.pallas import tpu as pltpu


def rgnn_kernel(x_ref, a_ref, wx_ref, bx_ref, whrz_ref, wrhl_ref,
                wcat_ref, selmask_ref, rowpool_ref, colpool_ref, blin_ref,
                out_ref):
    # Ref shapes (all full arrays, resident in VMEM; sizes are tiny):
    #   x_ref      : (T*B*N, D)   batch-stacked, time-major features (row = t*B*N + b*N + n)
    #   a_ref      : (B*N, B*N)   block-diagonal row-normalised adjacency (mean aggregation)
    #   wx_ref     : (D, 4H)      [wxr | wxz | wrx | wlx]
    #   bx_ref     : (1, 4H)      [bxr | bxz | bl  |  0 ]   (SAGE lin_l bias folded into wrx slot)
    #   whrz_ref   : (H, 2H)      [whr | whz]
    #   wrhl_ref   : (H, 2H)      [wrh | wlh]
    #   wcat_ref   : (H, N*C)     head weight regrouped per node: Wcat[k, n*C+c] = W3[n,k,c]
    #   selmask_ref: (B*N, N*C)   1 where (row % N) == (col // C)
    #   rowpool_ref: (B, B*N)     1 where col // N == row      (sum nodes of each batch)
    #   colpool_ref: (N*C, C)     1 where row % C == col       (sum per-node column blocks)
    #   blin_ref   : (1, C)       head bias
    #   out_ref    : (B, C)       softmax probabilities
    BN = a_ref.shape[0]          # B*N
    T = x_ref.shape[0] // BN     # number of timesteps
    H = whrz_ref.shape[0]        # hidden size

    a = a_ref[...]
    whrz = whrz_ref[...]
    wrhl = wrhl_ref[...]

    # One lane-dense projection of ALL timesteps & batches against all x-side weights,
    # with the gate biases and the SAGE lin_l bias folded in:  (T*B*N, D) x (D, 4H).
    xp_all = (jnp.dot(x_ref[...], wx_ref[...], preferred_element_type=jnp.float32)
              + bx_ref[...])

    h = jnp.zeros((BN, H), dtype=jnp.float32)
    for t in range(T):                       # T is small and static -> fully unrolled
        xp = xp_all[t * BN:(t + 1) * BN]                                 # (B*N, 4H) static slice
        # gates: sigmoid([x@wxr + bxr | x@wxz + bxz] + h @ [whr | whz])
        g = jax.nn.sigmoid(
            xp[:, 0:2 * H]
            + jnp.dot(h, whrz, preferred_element_type=jnp.float32))      # (B*N, 2H)
        r = g[:, 0:H]
        z = g[:, H:2 * H]
        rh = r * h
        rhp = jnp.dot(rh, wrhl, preferred_element_type=jnp.float32)      # [rh@wrh | rh@wlh]
        # SAGEConv (mean agg) via associativity: lin_l(A@[x, rh]) = A@(x@wlx + rh@wlh) + bl
        pre_agg = xp[:, 3 * H:4 * H] + rhp[:, H:2 * H]                   # (B*N, H)
        agg = jnp.dot(a, pre_agg, preferred_element_type=jnp.float32)    # ONE adjacency matmul
        n = agg + xp[:, 2 * H:3 * H] + rhp[:, 0:H]                       # + lin_r([x, rh]) + bl
        h = (1.0 - z) * n + z * h

    # Head for the whole batch, reshape-free:
    #   logits[b, c] = sum_{n,k} h[b*N+n, k] * W3[n, k, c]
    #                = (rowpool @ ((h @ Wcat) * selmask) @ colpool)[b, c]
    g_all = jnp.dot(h, wcat_ref[...], preferred_element_type=jnp.float32)   # (B*N, N*C)
    g_sel = g_all * selmask_ref[...]
    pooled = jnp.dot(rowpool_ref[...], g_sel, preferred_element_type=jnp.float32)   # (B, N*C)
    logits = (jnp.dot(pooled, colpool_ref[...], preferred_element_type=jnp.float32)
              + blin_ref[...])                                               # (B, C)

    # Exact softmax (exact divide: approx reciprocal previously broke the sum-to-1 check).
    mx = jnp.max(logits, axis=-1, keepdims=True)
    e = jnp.exp(logits - mx)
    out_ref[...] = e / jnp.sum(e, axis=-1, keepdims=True)


def build_norm_adjacency(edge_index0, num_nodes):
    """Dense row-normalised adjacency: A[i, j] = 1/in_deg(i) for each edge j -> i."""
    src = edge_index0[0]
    dst = edge_index0[1]
    A = jnp.zeros((num_nodes, num_nodes), jnp.float32).at[dst, src].add(1.0)
    deg = jnp.sum(A, axis=1, keepdims=True)
    return jnp.where(deg > 0, A / jnp.maximum(deg, 1.0), 0.0)


@functools.partial(jax.jit, static_argnames=("num_classes",))
def rgnn_forward(x, edge_index, params, num_classes):
    bs, N, T, D = x.shape
    H = params["whr"].shape[0]
    C = num_classes

    # Shared graph; block-diagonal (B*N, B*N) version so one MXU op aggregates the whole batch.
    A = build_norm_adjacency(edge_index[0], N)
    A_blk = jnp.kron(jnp.eye(bs, dtype=jnp.float32), A)

    # Batch-stacked, time-major node features: row index = t*bs*N + b*N + n.
    x_stack = jnp.transpose(x, (2, 0, 1, 3)).reshape(T * bs * N, D).astype(jnp.float32)

    # Fused x-side weights / biases.  bl is folded into the lin_r (wrx) slot only:
    # exact, since bl adds linearly after aggregation (never fold it through A,
    # whose rows may not sum to 1 for zero-in-degree nodes).
    zero_h = jnp.zeros((1, H), jnp.float32)
    wx_all = jnp.concatenate(
        [params["wxr"], params["wxz"], params["wrx"], params["wlx"]], axis=1)    # (D, 4H)
    bx_all = jnp.concatenate(
        [params["bxr"], params["bxz"], params["bl"], zero_h], axis=1)            # (1, 4H)
    whrz = jnp.concatenate([params["whr"], params["whz"]], axis=1)               # (H, 2H)
    wrhl = jnp.concatenate([params["wrh"], params["wlh"]], axis=1)               # (H, 2H)

    # Head as plain 2D matmuls (no in-kernel lane-dim-changing reshape):
    #   logits = rowpool @ ((h @ Wcat) * selmask) @ colpool + blin
    W3 = params["wlin"]                                                          # (N, H, C)
    wcat = jnp.transpose(W3, (1, 0, 2)).reshape(H, N * C)                        # (H, N*C)
    rows = jnp.arange(bs * N)
    cols = jnp.arange(N * C)
    selmask = ((rows[:, None] % N) == (cols[None, :] // C)).astype(jnp.float32)  # (B*N, N*C)
    rowpool = (jnp.arange(bs)[:, None] == (rows[None, :] // N)).astype(jnp.float32)  # (B, B*N)
    colpool = ((cols[:, None] % C) == jnp.arange(C)[None, :]).astype(jnp.float32)    # (N*C, C)

    vmem = pl.BlockSpec(memory_space=pltpu.MemorySpace.VMEM)
    out = pl.pallas_call(
        rgnn_kernel,
        out_shape=jax.ShapeDtypeStruct((bs, num_classes), jnp.float32),
        in_specs=[vmem] * 11,
        out_specs=vmem,
    )(x_stack, A_blk, wx_all, bx_all, whrz, wrhl,
      wcat, selmask, rowpool, colpool, params["blin"])
    return out


def rgnn_reference(x, edge_index, params):
    """Pure-JAX reference (same math, unfused, high-precision matmuls)."""
    bs, N, T, D = x.shape
    H = params["whr"].shape[0]
    hp = jax.lax.Precision.HIGHEST
    A = build_norm_adjacency(edge_index[0], N)
    h = jnp.zeros((bs, N, H), jnp.float32)
    for t in range(T):
        xt = x[:, :, t]
        r = jax.nn.sigmoid(jnp.dot(xt, params["wxr"], precision=hp) + params["bxr"]
                           + jnp.dot(h, params["whr"], precision=hp))
        z = jax.nn.sigmoid(jnp.dot(xt, params["wxz"], precision=hp) + params["bxz"]
                           + jnp.dot(h, params["whz"], precision=hp))
        rh = r * h
        agg_x = jnp.einsum("ij,bjd->bid", A, xt, precision=hp)
        agg_rh = jnp.einsum("ij,bjh->bih", A, rh, precision=hp)
        n = (jnp.dot(agg_x, params["wlx"], precision=hp)
             + jnp.dot(agg_rh, params["wlh"], precision=hp) + params["bl"]
             + jnp.dot(xt, params["wrx"], precision=hp)
             + jnp.dot(rh, params["wrh"], precision=hp))
        h = (1.0 - z) * n + z * h
    flat = h.reshape(bs, -1)
    wlin_flat = params["wlin"].reshape(-1, params["wlin"].shape[-1])
    logits = jnp.dot(flat, wlin_flat, precision=hp) + params["blin"]
    return jax.nn.softmax(logits, axis=-1)


def init_params(key, D, H, N, C):
    """Deterministic PyTorch-Linear-style init: U(-1/sqrt(fan_in), 1/sqrt(fan_in))."""
    def lin(k, fan_in, shape):
        bound = 1.0 / jnp.sqrt(fan_in)
        return jax.random.uniform(k, shape, jnp.float32, -bound, bound)

    ks = jax.random.split(key, 12)
    return {
        # GCRUCell gates (weights stored transposed: (in, out))
        "wxr": lin(ks[0], D, (D, H)), "bxr": lin(ks[1], D, (1, H)),
        "whr": lin(ks[2], H, (H, H)),
        "wxz": lin(ks[3], D, (D, H)), "bxz": lin(ks[4], D, (1, H)),
        "whz": lin(ks[5], H, (H, H)),
        # SAGEConv(in = D+H, out = H): lin_l split into x-part / h-part, lin_r likewise
        "wlx": lin(ks[6], D + H, (D, H)), "wlh": lin(ks[7], D + H, (H, H)),
        "bl":  lin(ks[8], D + H, (1, H)),
        "wrx": lin(ks[9], D + H, (D, H)), "wrh": lin(ks[10], D + H, (H, H)),
        # Head: Linear(N*H, C); weight^T stored as (N, H, C)
        "wlin": lin(ks[11], N * H, (N, H, C)),
        "blin": lin(jax.random.fold_in(key, 99), N * H, (1, C)),
    }


if __name__ == "__main__":
    # dimensions = [D, H, C], num_nodes = N
    B, N, T, D, H, C = 2, 8, 4, 16, 32, 8

    key = jax.random.PRNGKey(0)
    kx, kp = jax.random.split(key)
    x = jax.random.normal(kx, (B, N, T, D), jnp.float32)

    # Deterministic bidirectional ring graph; edge_index shaped (1, 2, E) so that
    # GCRU's `edge_index[0]` yields the usual (2, E) tensor.
    src = jnp.concatenate([jnp.arange(N), (jnp.arange(N) + 1) % N])
    dst = jnp.concatenate([(jnp.arange(N) + 1) % N, jnp.arange(N)])
    edge_index = jnp.stack([src, dst], axis=0)[None].astype(jnp.int32)  # (1, 2, 2N)

    params = init_params(kp, D, H, N, C)

    out = jax.block_until_ready(rgnn_forward(x, edge_index, params, num_classes=C))
    ref = rgnn_reference(x, edge_index, params)

    assert out.shape == (B, C)
    assert bool(jnp.allclose(jnp.sum(out, axis=-1), 1.0, atol=1e-3))
    assert bool(jnp.allclose(out, ref, atol=2e-3, rtol=2e-3))

    print("KERNEL_OK")
</pallas_src>

<mosaic_0001>
module attributes {stable_mosaic.version = 11 : i64} {
  func.func private @main(%arg0: i32) attributes {dimension_semantics = [#tpu.dimension_semantics<core_parallel>], iteration_bounds = array<i64: 2>, tpu.core_type = #tpu.core_type<sc_scalar_subcore>, window_params = []} {
    return
  }
}

module attributes {stable_mosaic.version = 11 : i64} {
  func.func private @main(%arg0: i32) attributes {dimension_semantics = [#tpu.dimension_semantics<core_parallel>], iteration_bounds = array<i64: 2>, tpu.core_type = #tpu.core_type<sc_scalar_subcore>, window_params = []} {
    return
  }
}

module attributes {stable_mosaic.version = 11 : i64} {
  func.func @rgnn_kernel(%arg0: memref<64x16xf32, #tpu.memory_space<vmem>>, %arg1: memref<16x16xf32, #tpu.memory_space<vmem>>, %arg2: memref<16x128xf32, #tpu.memory_space<vmem>>, %arg3: memref<1x128xf32, #tpu.memory_space<vmem>>, %arg4: memref<32x64xf32, #tpu.memory_space<vmem>>, %arg5: memref<32x64xf32, #tpu.memory_space<vmem>>, %arg6: memref<32x64xf32, #tpu.memory_space<vmem>>, %arg7: memref<16x64xf32, #tpu.memory_space<vmem>>, %arg8: memref<2x16xf32, #tpu.memory_space<vmem>>, %arg9: memref<64x8xf32, #tpu.memory_space<vmem>>, %arg10: memref<1x8xf32, #tpu.memory_space<vmem>>, %arg11: memref<2x8xf32, #tpu.memory_space<vmem>>) attributes {dimension_semantics = [], scalar_prefetch = 0 : i64, scratch_operands = 0 : i64, tpu.core_type = #tpu.core_type<tc>} {
    %c0 = arith.constant 0 : index
    %c0_0 = arith.constant 0 : index
    %0 = vector.load %arg1[%c0, %c0_0] : memref<16x16xf32, #tpu.memory_space<vmem>>, vector<16x16xf32>
    %c0_1 = arith.constant 0 : index
    %c0_2 = arith.constant 0 : index
    %1 = vector.load %arg4[%c0_1, %c0_2] : memref<32x64xf32, #tpu.memory_space<vmem>>, vector<32x64xf32>
    %c0_3 = arith.constant 0 : index
    %c0_4 = arith.constant 0 : index
    %2 = vector.load %arg5[%c0_3, %c0_4] : memref<32x64xf32, #tpu.memory_space<vmem>>, vector<32x64xf32>
    %c0_5 = arith.constant 0 : index
    %c0_6 = arith.constant 0 : index
    %3 = vector.load %arg0[%c0_5, %c0_6] : memref<64x16xf32, #tpu.memory_space<vmem>>, vector<64x16xf32>
    %c0_7 = arith.constant 0 : index
    %c0_8 = arith.constant 0 : index
    %4 = vector.load %arg2[%c0_7, %c0_8] : memref<16x128xf32, #tpu.memory_space<vmem>>, vector<16x128xf32>
    %cst = arith.constant dense<0.000000e+00> : vector<64x128xf32>
    %5 = tpu.matmul %3, %4, %cst {dimension_numbers = #tpu.dot_dimension_numbers<[1], [0], [0], [1], [0, 0, 1, 1], [], []>} : vector<64x16xf32>, vector<16x128xf32>, vector<64x128xf32> -> vector<64x128xf32>
    %c0_9 = arith.constant 0 : index
    %c0_10 = arith.constant 0 : index
    %6 = vector.load %arg3[%c0_9, %c0_10] : memref<1x128xf32, #tpu.memory_space<vmem>>, vector<1x128xf32>
    %7 = vector.broadcast %6 : vector<1x128xf32> to vector<64x128xf32>
    %8 = arith.addf %5, %7 : vector<64x128xf32>
    %cst_11 = arith.constant 0.000000e+00 : f32
    %9 = vector.broadcast %cst_11 : f32 to vector<16x32xf32>
    %10 = vector.extract_strided_slice %8 {offsets = [0, 0], sizes = [16, 128], strides = [1, 1]} : vector<64x128xf32> to vector<16x128xf32>
    %11 = vector.extract_strided_slice %10 {offsets = [0, 0], sizes = [16, 64], strides = [1, 1]} : vector<16x128xf32> to vector<16x64xf32>
    %cst_12 = arith.constant dense<0.000000e+00> : vector<16x64xf32>
    %12 = tpu.matmul %9, %1, %cst_12 {dimension_numbers = #tpu.dot_dimension_numbers<[1], [0], [0], [1], [0, 0, 1, 1], [], []>} : vector<16x32xf32>, vector<32x64xf32>, vector<16x64xf32> -> vector<16x64xf32>
    %13 = arith.addf %11, %12 : vector<16x64xf32>
    %14 = arith.negf %13 : vector<16x64xf32>
    %15 = math.exp %14 : vector<16x64xf32>
    %cst_13 = arith.constant 1.000000e+00 : f32
    %16 = vector.broadcast %cst_13 : f32 to vector<16x64xf32>
    %17 = arith.addf %16, %15 : vector<16x64xf32>
    %18 = arith.divf %16, %17 : vector<16x64xf32>
    %19 = vector.extract_strided_slice %18 {offsets = [0, 0], sizes = [16, 32], strides = [1, 1]} : vector<16x64xf32> to vector<16x32xf32>
    %20 = vector.extract_strided_slice %18 {offsets = [0, 32], sizes = [16, 32], strides = [1, 1]} : vector<16x64xf32> to vector<16x32xf32>
    %21 = arith.mulf %19, %9 : vector<16x32xf32>
    %cst_14 = arith.constant dense<0.000000e+00> : vector<16x64xf32>
    %22 = tpu.matmul %21, %2, %cst_14 {dimension_numbers = #tpu.dot_dimension_numbers<[1], [0], [0], [1], [0, 0, 1, 1], [], []>} : vector<16x32xf32>, vector<32x64xf32>, vector<16x64xf32> -> vector<16x64xf32>
    %23 = vector.extract_strided_slice %10 {offsets = [0, 96], sizes = [16, 32], strides = [1, 1]} : vector<16x128xf32> to vector<16x32xf32>
    %24 = vector.extract_strided_slice %22 {offsets = [0, 32], sizes = [16, 32], strides = [1, 1]} : vector<16x64xf32> to vector<16x32xf32>
    %25 = arith.addf %23, %24 : vector<16x32xf32>
    %cst_15 = arith.constant dense<0.000000e+00> : vector<16x32xf32>
    %26 = tpu.matmul %0, %25, %cst_15 {dimension_numbers = #tpu.dot_dimension_numbers<[1], [0], [0], [1], [0, 0, 1, 1], [], []>} : vector<16x16xf32>, vector<16x32xf32>, vector<16x32xf32> -> vector<16x32xf32>
    %27 = vector.extract_strided_slice %10 {offsets = [0, 64], sizes = [16, 32], strides = [1, 1]} : vector<16x128xf32> to vector<16x32xf32>
    %28 = arith.addf %26, %27 : vector<16x32xf32>
    %29 = vector.extract_strided_slice %22 {offsets = [0, 0], sizes = [16, 32], strides = [1, 1]} : vector<16x64xf32> to vector<16x32xf32>
    %30 = arith.addf %28, %29 : vector<16x32xf32>
    %cst_16 = arith.constant 1.000000e+00 : f32
    %31 = vector.broadcast %cst_16 : f32 to vector<16x32xf32>
    %32 = arith.subf %31, %20 : vector<16x32xf32>
    %33 = arith.mulf %32, %30 : vector<16x32xf32>
    %34 = arith.mulf %20, %9 : vector<16x32xf32>
    %35 = arith.addf %33, %34 : vector<16x32xf32>
    %36 = vector.extract_strided_slice %8 {offsets = [16, 0], sizes = [16, 128], strides = [1, 1]} : vector<64x128xf32> to vector<16x128xf32>
    %37 = vector.extract_strided_slice %36 {offsets = [0, 0], sizes = [16, 64], strides = [1, 1]} : vector<16x128xf32> to vector<16x64xf32>
    %cst_17 = arith.constant dense<0.000000e+00> : vector<16x64xf32>
    %38 = tpu.matmul %35, %1, %cst_17 {dimension_numbers = #tpu.dot_dimension_numbers<[1], [0], [0], [1], [0, 0, 1, 1], [], []>} : vector<16x32xf32>, vector<32x64xf32>, vector<16x64xf32> -> vector<16x64xf32>
    %39 = arith.addf %37, %38 : vector<16x64xf32>
    %40 = arith.negf %39 : vector<16x64xf32>
    %41 = math.exp %40 : vector<16x64xf32>
    %cst_18 = arith.constant 1.000000e+00 : f32
    %42 = vector.broadcast %cst_18 : f32 to vector<16x64xf32>
    %43 = arith.addf %42, %41 : vector<16x64xf32>
    %44 = arith.divf %42, %43 : vector<16x64xf32>
    %45 = vector.extract_strided_slice %44 {offsets = [0, 0], sizes = [16, 32], strides = [1, 1]} : vector<16x64xf32> to vector<16x32xf32>
    %46 = vector.extract_strided_slice %44 {offsets = [0, 32], sizes = [16, 32], strides = [1, 1]} : vector<16x64xf32> to vector<16x32xf32>
    %47 = arith.mulf %45, %35 : vector<16x32xf32>
    %cst_19 = arith.constant dense<0.000000e+00> : vector<16x64xf32>
    %48 = tpu.matmul %47, %2, %cst_19 {dimension_numbers = #tpu.dot_dimension_numbers<[1], [0], [0], [1], [0, 0, 1, 1], [], []>} : vector<16x32xf32>, vector<32x64xf32>, vector<16x64xf32> -> vector<16x64xf32>
    %49 = vector.extract_strided_slice %36 {offsets = [0, 96], sizes = [16, 32], strides = [1, 1]} : vector<16x128xf32> to vector<16x32xf32>
    %50 = vector.extract_strided_slice %48 {offsets = [0, 32], sizes = [16, 32], strides = [1, 1]} : vector<16x64xf32> to vector<16x32xf32>
    %51 = arith.addf %49, %50 : vector<16x32xf32>
    %cst_20 = arith.constant dense<0.000000e+00> : vector<16x32xf32>
    %52 = tpu.matmul %0, %51, %cst_20 {dimension_numbers = #tpu.dot_dimension_numbers<[1], [0], [0], [1], [0, 0, 1, 1], [], []>} : vector<16x16xf32>, vector<16x32xf32>, vector<16x32xf32> -> vector<16x32xf32>
    %53 = vector.extract_strided_slice %36 {offsets = [0, 64], sizes = [16, 32], strides = [1, 1]} : vector<16x128xf32> to vector<16x32xf32>
    %54 = arith.addf %52, %53 : vector<16x32xf32>
    %55 = vector.extract_strided_slice %48 {offsets = [0, 0], sizes = [16, 32], strides = [1, 1]} : vector<16x64xf32> to vector<16x32xf32>
    %56 = arith.addf %54, %55 : vector<16x32xf32>
    %cst_21 = arith.constant 1.000000e+00 : f32
    %57 = vector.broadcast %cst_21 : f32 to vector<16x32xf32>
    %58 = arith.subf %57, %46 : vector<16x32xf32>
    %59 = arith.mulf %58, %56 : vector<16x32xf32>
    %60 = arith.mulf %46, %35 : vector<16x32xf32>
    %61 = arith.addf %59, %60 : vector<16x32xf32>
    %62 = vector.extract_strided_slice %8 {offsets = [32, 0], sizes = [16, 128], strides = [1, 1]} : vector<64x128xf32> to vector<16x128xf32>
    %63 = vector.extract_strided_slice %62 {offsets = [0, 0], sizes = [16, 64], strides = [1, 1]} : vector<16x128xf32> to vector<16x64xf32>
    %cst_22 = arith.constant dense<0.000000e+00> : vector<16x64xf32>
    %64 = tpu.matmul %61, %1, %cst_22 {dimension_numbers = #tpu.dot_dimension_numbers<[1], [0], [0], [1], [0, 0, 1, 1], [], []>} : vector<16x32xf32>, vector<32x64xf32>, vector<16x64xf32> -> vector<16x64xf32>
    %65 = arith.addf %63, %64 : vector<16x64xf32>
    %66 = arith.negf %65 : vector<16x64xf32>
    %67 = math.exp %66 : vector<16x64xf32>
    %cst_23 = arith.constant 1.000000e+00 : f32
    %68 = vector.broadcast %cst_23 : f32 to vector<16x64xf32>
    %69 = arith.addf %68, %67 : vector<16x64xf32>
    %70 = arith.divf %68, %69 : vector<16x64xf32>
    %71 = vector.extract_strided_slice %70 {offsets = [0, 0], sizes = [16, 32], strides = [1, 1]} : vector<16x64xf32> to vector<16x32xf32>
    %72 = vector.extract_strided_slice %70 {offsets = [0, 32], sizes = [16, 32], strides = [1, 1]} : vector<16x64xf32> to vector<16x32xf32>
    %73 = arith.mulf %71, %61 : vector<16x32xf32>
    %cst_24 = arith.constant dense<0.000000e+00> : vector<16x64xf32>
    %74 = tpu.matmul %73, %2, %cst_24 {dimension_numbers = #tpu.dot_dimension_numbers<[1], [0], [0], [1], [0, 0, 1, 1], [], []>} : vector<16x32xf32>, vector<32x64xf32>, vector<16x64xf32> -> vector<16x64xf32>
    %75 = vector.extract_strided_slice %62 {offsets = [0, 96], sizes = [16, 32], strides = [1, 1]} : vector<16x128xf32> to vector<16x32xf32>
    %76 = vector.extract_strided_slice %74 {offsets = [0, 32], sizes = [16, 32], strides = [1, 1]} : vector<16x64xf32> to vector<16x32xf32>
    %77 = arith.addf %75, %76 : vector<16x32xf32>
    %cst_25 = arith.constant dense<0.000000e+00> : vector<16x32xf32>
    %78 = tpu.matmul %0, %77, %cst_25 {dimension_numbers = #tpu.dot_dimension_numbers<[1], [0], [0], [1], [0, 0, 1, 1], [], []>} : vector<16x16xf32>, vector<16x32xf32>, vector<16x32xf32> -> vector<16x32xf32>
    %79 = vector.extract_strided_slice %62 {offsets = [0, 64], sizes = [16, 32], strides = [1, 1]} : vector<16x128xf32> to vector<16x32xf32>
    %80 = arith.addf %78, %79 : vector<16x32xf32>
    %81 = vector.extract_strided_slice %74 {offsets = [0, 0], sizes = [16, 32], strides = [1, 1]} : vector<16x64xf32> to vector<16x32xf32>
    %82 = arith.addf %80, %81 : vector<16x32xf32>
    %cst_26 = arith.constant 1.000000e+00 : f32
    %83 = vector.broadcast %cst_26 : f32 to vector<16x32xf32>
    %84 = arith.subf %83, %72 : vector<16x32xf32>
    %85 = arith.mulf %84, %82 : vector<16x32xf32>
    %86 = arith.mulf %72, %61 : vector<16x32xf32>
    %87 = arith.addf %85, %86 : vector<16x32xf32>
    %88 = vector.extract_strided_slice %8 {offsets = [48, 0], sizes = [16, 128], strides = [1, 1]} : vector<64x128xf32> to vector<16x128xf32>
    %89 = vector.extract_strided_slice %88 {offsets = [0, 0], sizes = [16, 64], strides = [1, 1]} : vector<16x128xf32> to vector<16x64xf32>
    %cst_27 = arith.constant dense<0.000000e+00> : vector<16x64xf32>
    %90 = tpu.matmul %87, %1, %cst_27 {dimension_numbers = #tpu.dot_dimension_numbers<[1], [0], [0], [1], [0, 0, 1, 1], [], []>} : vector<16x32xf32>, vector<32x64xf32>, vector<16x64xf32> -> vector<16x64xf32>
    %91 = arith.addf %89, %90 : vector<16x64xf32>
    %92 = arith.negf %91 : vector<16x64xf32>
    %93 = math.exp %92 : vector<16x64xf32>
    %cst_28 = arith.constant 1.000000e+00 : f32
    %94 = vector.broadcast %cst_28 : f32 to vector<16x64xf32>
    %95 = arith.addf %94, %93 : vector<16x64xf32>
    %96 = arith.divf %94, %95 : vector<16x64xf32>
    %97 = vector.extract_strided_slice %96 {offsets = [0, 0], sizes = [16, 32], strides = [1, 1]} : vector<16x64xf32> to vector<16x32xf32>
    %98 = vector.extract_strided_slice %96 {offsets = [0, 32], sizes = [16, 32], strides = [1, 1]} : vector<16x64xf32> to vector<16x32xf32>
    %99 = arith.mulf %97, %87 : vector<16x32xf32>
    %cst_29 = arith.constant dense<0.000000e+00> : vector<16x64xf32>
    %100 = tpu.matmul %99, %2, %cst_29 {dimension_numbers = #tpu.dot_dimension_numbers<[1], [0], [0], [1], [0, 0, 1, 1], [], []>} : vector<16x32xf32>, vector<32x64xf32>, vector<16x64xf32> -> vector<16x64xf32>
    %101 = vector.extract_strided_slice %88 {offsets = [0, 96], sizes = [16, 32], strides = [1, 1]} : vector<16x128xf32> to vector<16x32xf32>
    %102 = vector.extract_strided_slice %100 {offsets = [0, 32], sizes = [16, 32], strides = [1, 1]} : vector<16x64xf32> to vector<16x32xf32>
    %103 = arith.addf %101, %102 : vector<16x32xf32>
    %cst_30 = arith.constant dense<0.000000e+00> : vector<16x32xf32>
    %104 = tpu.matmul %0, %103, %cst_30 {dimension_numbers = #tpu.dot_dimension_numbers<[1], [0], [0], [1], [0, 0, 1, 1], [], []>} : vector<16x16xf32>, vector<16x32xf32>, vector<16x32xf32> -> vector<16x32xf32>
    %105 = vector.extract_strided_slice %88 {offsets = [0, 64], sizes = [16, 32], strides = [1, 1]} : vector<16x128xf32> to vector<16x32xf32>
    %106 = arith.addf %104, %105 : vector<16x32xf32>
    %107 = vector.extract_strided_slice %100 {offsets = [0, 0], sizes = [16, 32], strides = [1, 1]} : vector<16x64xf32> to vector<16x32xf32>
    %108 = arith.addf %106, %107 : vector<16x32xf32>
    %cst_31 = arith.constant 1.000000e+00 : f32
    %109 = vector.broadcast %cst_31 : f32 to vector<16x32xf32>
    %110 = arith.subf %109, %98 : vector<16x32xf32>
    %111 = arith.mulf %110, %108 : vector<16x32xf32>
    %112 = arith.mulf %98, %87 : vector<16x32xf32>
    %113 = arith.addf %111, %112 : vector<16x32xf32>
    %c0_32 = arith.constant 0 : index
    %c0_33 = arith.constant 0 : index
    %114 = vector.load %arg6[%c0_32, %c0_33] : memref<32x64xf32, #tpu.memory_space<vmem>>, vector<32x64xf32>
    %cst_34 = arith.constant dense<0.000000e+00> : vector<16x64xf32>
    %115 = tpu.matmul %113, %114, %cst_34 {dimension_numbers = #tpu.dot_dimension_numbers<[1], [0], [0], [1], [0, 0, 1, 1], [], []>} : vector<16x32xf32>, vector<32x64xf32>, vector<16x64xf32> -> vector<16x64xf32>
    %c0_35 = arith.constant 0 : index
    %c0_36 = arith.constant 0 : index
    %116 = vector.load %arg7[%c0_35, %c0_36] : memref<16x64xf32, #tpu.memory_space<vmem>>, vector<16x64xf32>
    %117 = arith.mulf %115, %116 : vector<16x64xf32>
    %c0_37 = arith.constant 0 : index
    %c0_38 = arith.constant 0 : index
    %118 = vector.load %arg8[%c0_37, %c0_38] : memref<2x16xf32, #tpu.memory_space<vmem>>, vector<2x16xf32>
    %cst_39 = arith.constant dense<0.000000e+00> : vector<2x64xf32>
    %119 = tpu.matmul %118, %117, %cst_39 {dimension_numbers = #tpu.dot_dimension_numbers<[1], [0], [0], [1], [0, 0, 1, 1], [], []>} : vector<2x16xf32>, vector<16x64xf32>, vector<2x64xf32> -> vector<2x64xf32>
    %c0_40 = arith.constant 0 : index
    %c0_41 = arith.constant 0 : index
    %120 = vector.load %arg9[%c0_40, %c0_41] : memref<64x8xf32, #tpu.memory_space<vmem>>, vector<64x8xf32>
    %cst_42 = arith.constant dense<0.000000e+00> : vector<2x8xf32>
    %121 = tpu.matmul %119, %120, %cst_42 {dimension_numbers = #tpu.dot_dimension_numbers<[1], [0], [0], [1], [0, 0, 1, 1], [], []>} : vector<2x64xf32>, vector<64x8xf32>, vector<2x8xf32> -> vector<2x8xf32>
    %c0_43 = arith.constant 0 : index
    %c0_44 = arith.constant 0 : index
    %122 = vector.load %arg10[%c0_43, %c0_44] : memref<1x8xf32, #tpu.memory_space<vmem>>, vector<1x8xf32>
    %123 = vector.broadcast %122 : vector<1x8xf32> to vector<2x8xf32>
    %124 = arith.addf %121, %123 : vector<2x8xf32>
    %cst_45 = arith.constant dense<0xFF800000> : vector<2xf32>
    %125 = vector.multi_reduction <maximumf>, %124, %cst_45 [1] : vector<2x8xf32> to vector<2xf32>
    %126 = vector.shape_cast %125 : vector<2xf32> to vector<2x1xf32>
    %127 = vector.broadcast %126 : vector<2x1xf32> to vector<2x8xf32>
    %128 = arith.subf %124, %127 : vector<2x8xf32>
    %129 = math.exp %128 : vector<2x8xf32>
    %cst_46 = arith.constant dense<0.000000e+00> : vector<2xf32>
    %130 = vector.multi_reduction <add>, %129, %cst_46 [1] : vector<2x8xf32> to vector<2xf32>
    %131 = vector.shape_cast %130 : vector<2xf32> to vector<2x1xf32>
    %132 = vector.broadcast %131 : vector<2x1xf32> to vector<2x8xf32>
    %133 = arith.divf %129, %132 : vector<2x8xf32>
    %c0_47 = arith.constant 0 : index
    %c0_48 = arith.constant 0 : index
    %134 = vector.load %arg11[%c0_47, %c0_48] : memref<2x8xf32, #tpu.memory_space<vmem>>, vector<2x8xf32>
    tpu.vector_store %arg11[%c0_47, %c0_48], %133 {strides = array<i32>} : memref<2x8xf32, #tpu.memory_space<vmem>>, vector<2x8xf32>,
    return
  }
}

</mosaic_0001>

<bundles_post_ra>
// kernel: rgnn_forward.1
= control target key start
LH: loop header
LB: loop body
LE: loop exit
PB: predicated region body
PF: predicated region fallthrough
CT: control target
= control target key end

     0   :  { %vm66_vm0 = vcmask 130048   ;;  %s2560_s0 = inlined_call_operand.vmem [shape: f32[64,16], index: 0, kind: input, shape index: {}]   ;;  %s2561_s1 = inlined_call_operand.vmem [shape: f32[16,16], index: 1, kind: input, shape index: {}]   ;;  %s2562_s2 = inlined_call_operand.vmem [shape: f32[16,128], index: 2, kind: input, shape index: {}]   ;;  %s2563_s3 = inlined_call_operand.vmem [shape: f32[1,128], index: 3, kind: input, shape index: {}]   ;;  %s2564_s4 = inlined_call_operand.vmem [shape: f32[32,64], index: 4, kind: input, shape index: {}]   ;;  %s2565_s5 = inlined_call_operand.vmem [shape: f32[32,64], index: 5, kind: input, shape index: {}]   ;;  %s2566_s6 = inlined_call_operand.vmem [shape: f32[32,64], index: 6, kind: input, shape index: {}]   ;;  %s2567_s7 = inlined_call_operand.vmem [shape: f32[16,64], index: 7, kind: input, shape index: {}]   ;;  %s2568_s8 = inlined_call_operand.vmem [shape: f32[2,16], index: 8, kind: input, shape index: {}]   ;;  %s2569_s9 = inlined_call_operand.vmem [shape: f32[64,8], index: 9, kind: input, shape index: {}]   ;;  %s2570_s10 = inlined_call_operand.vmem [shape: f32[1,8], index: 10, kind: input, shape index: {}]   ;;  %s2571_s11 = inlined_call_operand.hbm [shape: f32[2,8], index: 11, kind: output, shape index: {}]  }
   0x1   :  { %v57_v0 = vld [vmem:[%s2562_s2] sm:$0xff]  ;;  %v58_v1 = vld [vmem:[%s2562_s2 + $0x8] sm:$0xff]  ;;  %v43_v7 = vld [vmem:[%s2564_s4 + $0x10] sm:$0xff] }
   0x2   :  { %v49_v2 = vld [vmem:[%s2560_s0] sm:$0xff]  ;;  %v1992_v3 = vpack.c.bf16 %v58_v1, %v57_v0  ;;  %v42_v5 = vld [vmem:[%s2564_s4 + $0x8] sm:$0xff]  ;;  %v44_v8 = vld [vmem:[%s2564_s4 + $0x18] sm:$0xff] }
   0x3   :  { %1827 = vmatprep.mubr.msk.f32.mxu0 %vm66_vm0, %v49_v2  ;;  %v41_v4 = vld [vmem:[%s2564_s4] sm:$0xff]  ;;  %v50_v9 = vld [vmem:[%s2560_s0 + $0x8] sm:$0xff] }
   0x4   :  { %v2269_v6 = vpack.c.bf16 %v42_v5, %v41_v4  ;;  %1993 = vmatprep.subr.bf16.mxu0 %v1992_v3 }
   0x5   :  { %1995 = vmatpush3.bf16.msra.mxu0 %v1992_v3 }
   0x6   :  { %16 = vsyncpa [#allocation3], 0  ;;  %1997 = vmatprep.subr.bf16.mxu0 %v2269_v6  ;;  %v51_v10 = vld [vmem:[%s2560_s0 + $0x10] sm:$0xff]  ;;  %v2284_v11 = vpack.c.bf16 %v44_v8, %v43_v7  ;;  %v52_v12 = vld [vmem:[%s2560_s0 + $0x18] sm:$0xff]  ;;  %v2186_v17 = vmov 0.0   ;;  %vm196_vm1 = vcmask 261120  }
   0x7   :  { %v53_v13 = vld [vmem:[%s2560_s0 + $0x20] sm:$0xff]  ;;  %v54_v14 = vld [vmem:[%s2560_s0 + $0x28] sm:$0xff]  ;;  %v55_v15 = vld [vmem:[%s2560_s0 + $0x30] sm:$0xff]  ;;  %s2188_s14 = smov 32   ;;  %vm2191_vm2 = vmmov 0   ;;  %vm1586_vm3 = vcmask 523264  }
   0x8   :  { %1828 = vmatmul.mubr.msk.f32.vlgmr.msra.gmra.mrb[0].mxu0 %vm66_vm0, %v50_v9  ;;  %v56_v16 = vld [vmem:[%s2560_s0 + $0x38] sm:$0xff]  ;;  %v45_v18 = vld [vmem:[%s2565_s5] sm:$0xff]  ;;  %v46_v19 = vld [vmem:[%s2565_s5 + $0x8] sm:$0xff]  ;;  %vm1660_vm4 = vcmask 58368  }
   0x9   :  { %1999 = vmatpush3.bf16.msra.mxu0 %v2269_v6  ;;  %1830 = vmatprep.mubr.msk.f32.mxu0 %vm66_vm0, %v51_v10  ;;  %v47_v20 = vld [vmem:[%s2565_s5 + $0x10] sm:$0xff]  ;;  %v2322_v21 = vpack.c.bf16 %v46_v19, %v45_v18  ;;  %v48_v22 = vld [vmem:[%s2565_s5 + $0x18] sm:$0xff]  ;;  %v1687_v26 = vld [vmem:[%s2563_s3] ss:$0 sm:$0xff]  ;;  %s2187_s3 = smov 64  }
   0xa   :  { %2001 = vmatprep.subr.bf16.mxu0 %v2284_v11  ;;  %v2327_v23 = vpack.c.bf16 %v48_v22, %v47_v20  ;;  %v2360_v58 = vld [vmem:[%s2561_s1] sm:$0xff]  ;;  %v2369_v3 = vld [vmem:[%s2561_s1 + $0x8] sm:$0xff]  ;;  %s2189_s1 = smov 96  }
   0xb   :  { %2005 = vmatprep.subr.bf16.mxu1 %v2322_v21 }
   0xc   :  { %1831 = vmatmul.mubr.msk.f32.gmra.mrb[2].mxu0 %vm66_vm0, %v52_v12  ;;  %2007 = vmatpush3.bf16.msra.mxu1 %v2322_v21 }
   0xd   :  { %1833 = vmatprep.mubr.msk.f32.mxu0 %vm66_vm0, %v53_v13  ;;  %2003 = vmatpush3.bf16.msra.mxu0 %v2284_v11 }
   0xe   :  { %2009 = vmatprep.subr.bf16.mxu1 %v2327_v23 }
  0x10   :  { %1834 = vmatmul.mubr.msk.f32.gmra.mrb[4].mxu0 %vm66_vm0, %v54_v14  ;;  %2011 = vmatpush3.bf16.msra.mxu1 %v2327_v23 }
  0x11   :  { %1836 = vmatprep.mubr.msk.f32.mxu0 %vm66_vm0, %v55_v15  ;;  %2017 = vmatprep.subr.bf16.mxu1 %v2269_v6 }
  0x14   :  { %1837 = vmatmul.mubr.msk.f32.gmra.mrb[6].mxu0 %vm66_vm0, %v56_v16 }
  0x15   :  { %1847 = vmatprep.mubr.f32.mxu0 %v2186_v17 }
  0x18   :  { %1848 = vmatmul.mubr.f32.vlgmr.msra.gmra.mrb[8].mxu0 %v2186_v17 }
  0x19   :  { %1865 = vmatprep.mubr.msk.f32.mxu0 %vm66_vm0, %v2360_v58 }
  0xdb   :  { %v1829_v24 = vpop.f32.mrb[0].mxu0 }
  0xdc   :  { %v157_v25 = vpop.f32.mrb[1].mxu0  ;;  %v163_v39 = vadd.f32 %v1829_v24, %v1687_v26 }
  0xdd   :  { %v158_v40 = vadd.f32 %v1687_v26, %v157_v25 }
  0xdf   :  { %v1832_v27 = vpop.f32.mrb[2].mxu0 }
  0xe0   :  { %v2337_v28 = vadd.f32 %v1832_v27, %v1687_v26  ;;  %v167_v29 = vpop.f32.mrb[3].mxu0 }
  0xe1   :  { %v2339_v30 = vadd.f32 %v1687_v26, %v167_v29 }
  0xe3   :  { %v1835_v31 = vpop.f32.mrb[4].mxu0 }
  0xe4   :  { %v2341_v32 = vadd.f32 %v1835_v31, %v1687_v26  ;;  %v177_v33 = vpop.f32.mrb[5].mxu0 }
  0xe5   :  { %v2343_v34 = vadd.f32 %v1687_v26, %v177_v33 }
  0xe7   :  { %v1838_v35 = vpop.f32.mrb[6].mxu0 }
  0xe8   :  { %v2345_v36 = vadd.f32 %v1838_v35, %v1687_v26  ;;  %v187_v37 = vpop.f32.mrb[7].mxu0 }
  0xe9   :  { %v2347_v38 = vadd.f32 %v1687_v26, %v187_v37 }
  0xeb   :  { %v1849_v41 = vpop.f32.mrb[8].mxu0 }
  0xec   :  { %v276_v42 = vadd.f32 %v1849_v41, %v163_v39  ;;  %v266_v43 = vpop.f32.mrb[9].mxu0 }
  0xed   :  { %v275_v44 = vadd.f32 %v266_v43, %v158_v40 }
  0xee   :  { %v1697_v45 = vmul.f32 -1.442695, %v276_v42 }
  0xef   :  { %v1696_v46 = vmul.f32 -1.442695, %v275_v44 }
  0xf0   :  { %2126 = vpow2.f32 %v1697_v45 }
  0xf1   :  { %2128 = vpow2.f32 %v1696_v46 }
  0xfa   :  { %v2127_v47 = vpop.eup %2126 }
  0xfb   :  { %v2129_v48 = vpop.eup %2128  ;;  %v284_v49 = vadd.f32 1.0, %v2127_v47 }
  0xfc   :  { %v283_v50 = vadd.f32 1.0, %v2129_v48 }
  0xfd   :  { %2130 = vrcp.f32 %v284_v49 }
  0xfe   :  { %2132 = vrcp.f32 %v283_v50 }
 0x107   :  { %v2131_v51 = vpop.eup %2130 }
 0x108   :  { %v2133_v52 = vpop.eup %2132  ;;  %v290_v54 = vmul.f32 0.0, %v2131_v51  ;;  %v482_v14 = vsub.f32 1.0, %v2131_v51 }
 0x109   :  { %v289_v53 = vmul.f32 0.0, %v2133_v52  ;;  %v481_v16 = vsub.f32 1.0, %v2133_v52 }
 0x10b   :  { %1858 = vmatprep.mubr.msk.f32.mxu1 %vm196_vm1, %v289_v53 }
 0x10c   :  { %1859 = vmatmul.mubr.msk.f32.vlgmr.msra.gmra.mrb[0].mxu1 %vm196_vm1, %v290_v54 }
 0x10d   :  { %2019 = vmatpush3.bf16.msra.mxu1 %v2269_v6 }
 0x10e   :  { %2021 = vmatprep.subr.bf16.mxu1 %v2284_v11 }
 0x111   :  { %2023 = vmatpush3.bf16.msra.mxu1 %v2284_v11 }
 0x1df   :  { %v1860_v55 = vpop.f32.mrb[0].mxu1 }
 0x1e0   :  { %v363_v56 = vpop.f32.mrb[1].mxu1 }
 0x1e1   :  { %374 = vrot.lane.b32.xlu0 %v363_v56, %s2187_s3 }
 0x1e5   :  { %376 = vrot.lane.b32.xlu0 %v1860_v55, %s2187_s3 }
 0x1e9   :  { %394 = vrot.lane.b32.xlu0 %v163_v39, %s2187_s3 }
 0x253   :  { %v375_v57 = vpop.permute.xlu0 %374 }
 0x254   :  { %v380_v60 = vadd.f32 %v375_v57, %v158_v40 }
 0x257   :  { %v377_v59 = vpop.permute.xlu0 %376 }
 0x258   :  { %v381_v61 = vadd.f32 %v377_v59, %v163_v39 }
 0x25a   :  { %v2106_v62 = vpack.i.bf16 %v381_v61, %v380_v60 }
 0x25b   :  { %v395_v4 = vpop.permute.xlu0 %394 }
 0x25c   :  { %2107 = vrot.lane.b32.xlu1 %v2106_v62, %s2188_s14 }
 0x260   :  { %392 = vrot.lane.b32.xlu1 %v158_v40, %s2187_s3 }
 0x2ce   :  { %v2108_v63 = vpop.permute.xlu1 %2107 }
 0x2cf   :  { %v2110_v0 = vunpack.i.h.bf16 %v2108_v63  ;;  %v2109_v1 = vunpack.i.l.bf16 %v2108_v63 }
 0x2d1   :  { %v2012_v2 = vpack.c.bf16 %v2110_v0, %v2109_v1 }
 0x2d2   :  { %v393_v7 = vpop.permute.xlu1 %392 }
 0x2d3   :  { %2013 = vmatprep.subr.bf16.mxu0 %v2012_v2 }
 0x2d4   :  { %2015 = vmatpush3.bf16.msra.mxu0 %v2012_v2 }
 0x2d5   :  { %2025 = vmatprep.subr.bf16.mxu0 %v2322_v21 }
 0x2d7   :  { %1866 = vmatmul.mubr.msk.f32.vlgmr.msra.gmra.mrb[10].mxu0 %vm66_vm0, %v2369_v3 }
 0x2d8   :  { %2027 = vmatpush3.bf16.msra.mxu0 %v2322_v21 }
 0x2d9   :  { %2029 = vmatprep.subr.bf16.mxu0 %v2327_v23 }
 0x2dc   :  { %2031 = vmatpush3.bf16.msra.mxu0 %v2327_v23 }
 0x2dd   :  { %2037 = vmatprep.subr.bf16.mxu0 %v2269_v6 }
 0x3aa   :  { %v1867_v5 = vpop.f32.mrb[10].mxu0 }
 0x3ab   :  { %v476_v8 = vadd.f32 %v1867_v5, %v395_v4  ;;  %v470_v9 = vpop.f32.mrb[11].mxu0 }
 0x3ac   :  { %v471_v10 = vadd.f32 %v470_v9, %v393_v7 }
 0x3ad   :  { %v480_v12 = vadd.f32 %v1860_v55, %v476_v8 }
 0x3ae   :  { %v479_v13 = vadd.f32 %v471_v10, %v363_v56 }
 0x3af   :  { %487 = vrot.lane.b32.xlu0 %v480_v12, %s2188_s14 }
 0x3b0   :  { %485 = vrot.lane.b32.xlu1 %v479_v13, %s2188_s14 }
 0x421   :  { %v488_v15 = vpop.permute.xlu0 %487 }
 0x422   :  { %v492_v18 = vmul.f32 %v488_v15, %v482_v14  ;;  %v486_v19 = vpop.permute.xlu1 %485 }
 0x423   :  { %v491_v20 = vmul.f32 %v486_v19, %v481_v16 }
 0x424   :  { %v2380_v22 = vadd.f32 %v492_v18, %v290_v54 }
 0x425   :  { %v2382_v24 = vadd.f32 %v491_v20, %v289_v53 }
 0x426   :  { %499 = vrot.lane.b32.xlu0 %v2380_v22, %s2189_s1 }
 0x427   :  { %497 = vrot.lane.b32.xlu1 %v2382_v24, %s2189_s1 }
 0x498   :  { %v500_v26 = vpop.permute.xlu0 %499 }
 0x499   :  { %v498_v25 = vpop.permute.xlu1 %497 }
 0x49a   :  { %1876 = vmatprep.mubr.msk.f32.mxu1 %vm196_vm1, %v498_v25 }
 0x49b   :  { %1877 = vmatmul.mubr.msk.f32.vlgmr.msra.gmra.mrb[2].mxu1 %vm196_vm1, %v500_v26 }
 0x49c   :  { %1894 = vmatprep.mubr.msk.f32.mxu1 %vm66_vm0, %v2360_v58 }
 0x56e   :  { %v1878_v27 = vpop.f32.mrb[2].mxu1 }
 0x56f   :  { %v581_v29 = vadd.f32 %v1878_v27, %v2337_v28  ;;  %v571_v31 = vpop.f32.mrb[3].mxu1 }
 0x570   :  { %v580_v33 = vadd.f32 %v571_v31, %v2339_v30 }
 0x571   :  { %v1705_v35 = vmul.f32 -1.442695, %v581_v29 }
 0x572   :  { %v1704_v37 = vmul.f32 -1.442695, %v580_v33 }
 0x573   :  { %2134 = vpow2.f32 %v1705_v35 }
 0x574   :  { %2136 = vpow2.f32 %v1704_v37 }
 0x57d   :  { %v2135_v39 = vpop.eup %2134 }
 0x57e   :  { %v2137_v40 = vpop.eup %2136  ;;  %v589_v41 = vadd.f32 1.0, %v2135_v39 }
 0x57f   :  { %v588_v42 = vadd.f32 1.0, %v2137_v40 }
 0x580   :  { %2138 = vrcp.f32 %v589_v41 }
 0x581   :  { %2140 = vrcp.f32 %v588_v42 }
 0x58a   :  { %v2139_v43 = vpop.eup %2138 }
 0x58b   :  { %v2141_v44 = vpop.eup %2140  ;;  %v597_v46 = vmul.f32 %v2139_v43, %v500_v26  ;;  %v783_v1 = vsub.f32 1.0, %v2139_v43  ;;  %v795_v5 = vmul.f32 %v2139_v43, %v2380_v22 }
 0x58c   :  { %v596_v45 = vmul.f32 %v2141_v44, %v498_v25  ;;  %v782_v4 = vsub.f32 1.0, %v2141_v44  ;;  %v794_v9 = vmul.f32 %v2141_v44, %v2382_v24 }
 0x58e   :  { %1887 = vmatprep.mubr.msk.f32.mxu0 %vm196_vm1, %v596_v45 }
 0x58f   :  { %1888 = vmatmul.mubr.msk.f32.vlgmr.msra.gmra.mrb[12].mxu0 %vm196_vm1, %v597_v46 }
 0x590   :  { %2039 = vmatpush3.bf16.msra.mxu0 %v2269_v6 }
 0x591   :  { %2041 = vmatprep.subr.bf16.mxu0 %v2284_v11 }
 0x594   :  { %2043 = vmatpush3.bf16.msra.mxu0 %v2284_v11 }
 0x662   :  { %v1889_v47 = vpop.f32.mrb[12].mxu0 }
 0x663   :  { %683 = vrot.lane.b32.xlu0 %v1889_v47, %s2187_s3  ;;  %v670_v48 = vpop.f32.mrb[13].mxu0 }
 0x664   :  { %681 = vrot.lane.b32.xlu1 %v670_v48, %s2187_s3 }
 0x667   :  { %699 = vrot.lane.b32.xlu0 %v2339_v30, %s2187_s3 }
 0x6d5   :  { %v684_v49 = vpop.permute.xlu0 %683 }
 0x6d6   :  { %v688_v50 = vadd.f32 %v684_v49, %v2337_v28  ;;  %v682_v51 = vpop.permute.xlu1 %681 }
 0x6d7   :  { %v687_v52 = vadd.f32 %v682_v51, %v2339_v30 }
 0x6d9   :  { %v2111_v53 = vpack.i.bf16 %v688_v50, %v687_v52  ;;  %v700_v59 = vpop.permute.xlu0 %699 }
 0x6db   :  { %2112 = vrot.lane.b32.xlu1 %v2111_v53, %s2188_s14 }
 0x6df   :  { %701 = vrot.lane.b32.xlu1 %v2337_v28, %s2187_s3 }
 0x74d   :  { %v2113_v54 = vpop.permute.xlu1 %2112 }
 0x74e   :  { %v2115_v55 = vunpack.i.h.bf16 %v2113_v54  ;;  %v2114_v56 = vunpack.i.l.bf16 %v2113_v54 }
 0x750   :  { %v2032_v57 = vpack.c.bf16 %v2115_v55, %v2114_v56 }
 0x751   :  { %v702_v28 = vpop.permute.xlu1 %701 }
 0x752   :  { %2033 = vmatprep.subr.bf16.mxu1 %v2032_v57 }
 0x753   :  { %2035 = vmatpush3.bf16.msra.mxu1 %v2032_v57 }
 0x754   :  { %2045 = vmatprep.subr.bf16.mxu1 %v2322_v21 }
 0x756   :  { %1895 = vmatmul.mubr.msk.f32.vlgmr.msra.gmra.mrb[4].mxu1 %vm66_vm0, %v2369_v3 }
 0x757   :  { %2047 = vmatpush3.bf16.msra.mxu1 %v2322_v21 }
 0x758   :  { %2049 = vmatprep.subr.bf16.mxu1 %v2327_v23 }
 0x75b   :  { %2051 = vmatpush3.bf16.msra.mxu1 %v2327_v23 }
 0x75c   :  { %2057 = vmatprep.subr.bf16.mxu1 %v2269_v6 }
 0x829   :  { %v1896_v30 = vpop.f32.mrb[4].mxu1 }
 0x82a   :  { %v777_v60 = vadd.f32 %v1896_v30, %v702_v28  ;;  %v771_v61 = vpop.f32.mrb[5].mxu1 }
 0x82b   :  { %v772_v62 = vadd.f32 %v771_v61, %v700_v59 }
 0x82c   :  { %v781_v63 = vadd.f32 %v1889_v47, %v777_v60 }
 0x82d   :  { %v780_v0 = vadd.f32 %v772_v62, %v670_v48 }
 0x82e   :  { %788 = vrot.lane.b32.xlu1 %v781_v63, %s2188_s14 }
 0x82f   :  { %786 = vrot.lane.b32.xlu0 %v780_v0, %s2188_s14 }
 0x8a0   :  { %v789_v2 = vpop.permute.xlu1 %788 }
 0x8a1   :  { %v793_v7 = vmul.f32 %v789_v2, %v783_v1  ;;  %v787_v8 = vpop.permute.xlu0 %786 }
 0x8a2   :  { %v792_v10 = vmul.f32 %v787_v8, %v782_v4 }
 0x8a3   :  { %v2419_v12 = vadd.f32 %v795_v5, %v793_v7 }
 0x8a4   :  { %v2421_v13 = vadd.f32 %v794_v9, %v792_v10 }
 0x8a5   :  { %802 = vrot.lane.b32.xlu1 %v2419_v12, %s2189_s1 }
 0x8a6   :  { %800 = vrot.lane.b32.xlu0 %v2421_v13, %s2189_s1 }
 0x917   :  { %v803_v15 = vpop.permute.xlu1 %802 }
 0x918   :  { %v801_v14 = vpop.permute.xlu0 %800 }
 0x919   :  { %1905 = vmatprep.mubr.msk.f32.mxu0 %vm196_vm1, %v801_v14 }
 0x91a   :  { %1906 = vmatmul.mubr.msk.f32.vlgmr.msra.gmra.mrb[14].mxu0 %vm196_vm1, %v803_v15 }
 0x91b   :  { %1923 = vmatprep.mubr.msk.f32.mxu0 %vm66_vm0, %v2360_v58 }
 0x9ed   :  { %v1907_v16 = vpop.f32.mrb[14].mxu0 }
 0x9ee   :  { %v884_v18 = vadd.f32 %v1907_v16, %v2341_v32  ;;  %v874_v19 = vpop.f32.mrb[15].mxu0 }
 0x9ef   :  { %v883_v20 = vadd.f32 %v874_v19, %v2343_v34 }
 0x9f0   :  { %v1713_v22 = vmul.f32 -1.442695, %v884_v18 }
 0x9f1   :  { %v1712_v24 = vmul.f32 -1.442695, %v883_v20 }
 0x9f2   :  { %2142 = vpow2.f32 %v1713_v22 }
 0x9f3   :  { %2144 = vpow2.f32 %v1712_v24 }
 0x9fc   :  { %v2143_v25 = vpop.eup %2142 }
 0x9fd   :  { %v2145_v26 = vpop.eup %2144  ;;  %v892_v27 = vadd.f32 1.0, %v2143_v25 }
 0x9fe   :  { %v891_v29 = vadd.f32 1.0, %v2145_v26 }
 0x9ff   :  { %2146 = vrcp.f32 %v892_v27 }
 0xa00   :  { %2148 = vrcp.f32 %v891_v29 }
 0xa09   :  { %v2147_v31 = vpop.eup %2146 }
 0xa0a   :  { %v2149_v33 = vpop.eup %2148  ;;  %v900_v37 = vmul.f32 %v2147_v31, %v803_v15  ;;  %v1086_v54 = vsub.f32 1.0, %v2147_v31 }
 0xa0b   :  { %v899_v35 = vmul.f32 %v2149_v33, %v801_v14  ;;  %v1085_v56 = vsub.f32 1.0, %v2149_v33 }
 0xa0d   :  { %1916 = vmatprep.mubr.msk.f32.mxu1 %vm196_vm1, %v899_v35  ;;  %v1407_v35 = vld [vmem:[%s2566_s6 + $0x18] sm:$0xff] }
 0xa0e   :  { %1917 = vmatmul.mubr.msk.f32.vlgmr.msra.gmra.mrb[6].mxu1 %vm196_vm1, %v900_v37 }
 0xa0f   :  { %2059 = vmatpush3.bf16.msra.mxu1 %v2269_v6 }
 0xa10   :  { %2061 = vmatprep.subr.bf16.mxu1 %v2284_v11 }
 0xa13   :  { %2063 = vmatpush3.bf16.msra.mxu1 %v2284_v11 }
 0xae1   :  { %v1918_v39 = vpop.f32.mrb[6].mxu1 }
 0xae2   :  { %986 = vrot.lane.b32.xlu1 %v1918_v39, %s2187_s3  ;;  %v973_v40 = vpop.f32.mrb[7].mxu1 }
 0xae3   :  { %984 = vrot.lane.b32.xlu0 %v973_v40, %s2187_s3 }
 0xae6   :  { %1002 = vrot.lane.b32.xlu1 %v2343_v34, %s2187_s3 }
 0xb54   :  { %v987_v41 = vpop.permute.xlu1 %986 }
 0xb55   :  { %v991_v42 = vadd.f32 %v987_v41, %v2341_v32  ;;  %v985_v43 = vpop.permute.xlu0 %984 }
 0xb56   :  { %v990_v44 = vadd.f32 %v985_v43, %v2343_v34 }
 0xb58   :  { %v2116_v6 = vpack.i.bf16 %v991_v42, %v990_v44 }
 0xb5a   :  { %2117 = vrot.lane.b32.xlu0 %v2116_v6, %s2188_s14 }
 0xb5e   :  { %1004 = vrot.lane.b32.xlu0 %v2341_v32, %s2187_s3  ;;  %v1003_v32 = vpop.permute.xlu1 %1002 }
 0xbcc   :  { %v2118_v11 = vpop.permute.xlu0 %2117 }
 0xbcd   :  { %v2120_v45 = vunpack.i.h.bf16 %v2118_v11  ;;  %v2119_v46 = vunpack.i.l.bf16 %v2118_v11 }
 0xbcf   :  { %v2052_v47 = vpack.c.bf16 %v2120_v45, %v2119_v46 }
 0xbd0   :  { %v1005_v34 = vpop.permute.xlu0 %1004 }
 0xbd1   :  { %2053 = vmatprep.subr.bf16.mxu0 %v2052_v47 }
 0xbd2   :  { %2055 = vmatpush3.bf16.msra.mxu0 %v2052_v47 }
 0xbd3   :  { %2065 = vmatprep.subr.bf16.mxu0 %v2322_v21 }
 0xbd5   :  { %1924 = vmatmul.mubr.msk.f32.vlgmr.msra.gmra.mrb[16].mxu0 %vm66_vm0, %v2369_v3 }
 0xbd6   :  { %2067 = vmatpush3.bf16.msra.mxu0 %v2322_v21  ;;  %v1098_v21 = vmul.f32 %v2147_v31, %v2419_v12  ;;  %v1404_v31 = vld [vmem:[%s2566_s6] sm:$0xff] }
 0xbd7   :  { %2069 = vmatprep.subr.bf16.mxu0 %v2327_v23 }
 0xbda   :  { %2071 = vmatpush3.bf16.msra.mxu0 %v2327_v23  ;;  %v1097_v23 = vmul.f32 %v2149_v33, %v2421_v13 }
 0xca8   :  { %v1925_v48 = vpop.f32.mrb[16].mxu0 }
 0xca9   :  { %v1080_v49 = vadd.f32 %v1925_v48, %v1005_v34  ;;  %v1074_v50 = vpop.f32.mrb[17].mxu0 }
 0xcaa   :  { %v1075_v51 = vadd.f32 %v1074_v50, %v1003_v32 }
 0xcab   :  { %v1084_v52 = vadd.f32 %v1918_v39, %v1080_v49 }
 0xcac   :  { %v1083_v53 = vadd.f32 %v1075_v51, %v973_v40 }
 0xcad   :  { %1091 = vrot.lane.b32.xlu0 %v1084_v52, %s2188_s14 }
 0xcae   :  { %1089 = vrot.lane.b32.xlu1 %v1083_v53, %s2188_s14 }
 0xd1f   :  { %v1092_v55 = vpop.permute.xlu0 %1091 }
 0xd20   :  { %v1096_v57 = vmul.f32 %v1092_v55, %v1086_v54  ;;  %v1090_v28 = vpop.permute.xlu1 %1089  ;;  %v2190_v54 = vmov 0.0|0.0   ;;  %v1494_v55 = vld [vmem:[%s2567_s7 + $0x8] sm:$0xff] }
 0xd21   :  { %v1095_v30 = vmul.f32 %v1090_v28, %v1085_v56  ;;  %v1493_v56 = vld [vmem:[%s2567_s7] sm:$0xff] }
 0xd22   :  { %v2457_v59 = vadd.f32 %v1098_v21, %v1096_v57 }
 0xd23   :  { %v2459_v60 = vadd.f32 %v1097_v23, %v1095_v30  ;;  %v1571_v30 = vld [vmem:[%s2569_s9] sm:$0xff] }
 0xd24   :  { %1105 = vrot.lane.b32.xlu0 %v2457_v59, %s2189_s1 }
 0xd25   :  { %1103 = vrot.lane.b32.xlu1 %v2459_v60, %s2189_s1 }
 0xd96   :  { %v1106_v62 = vpop.permute.xlu0 %1105 }
 0xd97   :  { %v1104_v61 = vpop.permute.xlu1 %1103 }
 0xd98   :  { %1934 = vmatprep.mubr.msk.f32.mxu1 %vm196_vm1, %v1104_v61 }
 0xd99   :  { %1935 = vmatmul.mubr.msk.f32.vlgmr.msra.gmra.mrb[8].mxu1 %vm196_vm1, %v1106_v62 }
 0xd9a   :  { %1952 = vmatprep.mubr.msk.f32.mxu1 %vm66_vm0, %v2360_v58 }
 0xe6c   :  { %v1936_v63 = vpop.f32.mrb[8].mxu1 }
 0xe6d   :  { %v1187_v0 = vadd.f32 %v1936_v63, %v2345_v36  ;;  %v1177_v1 = vpop.f32.mrb[9].mxu1  ;;  %v1573_v63 = vld [vmem:[%s2569_s9 + $0x10] sm:$0xff] }
 0xe6e   :  { %v1186_v2 = vadd.f32 %v1177_v1, %v2347_v38 }
 0xe6f   :  { %v1721_v4 = vmul.f32 -1.442695, %v1187_v0  ;;  %v1574_v0 = vld [vmem:[%s2569_s9 + $0x18] sm:$0xff] }
 0xe70   :  { %v1720_v5 = vmul.f32 -1.442695, %v1186_v2  ;;  %v2091_v1 = vpack.c.bf16 %v1574_v0, %v1573_v63  ;;  %v1575_v2 = vld [vmem:[%s2569_s9 + $0x20] sm:$0xff] }
 0xe71   :  { %2150 = vpow2.f32 %v1721_v4  ;;  %v1576_v4 = vld [vmem:[%s2569_s9 + $0x28] sm:$0xff] }
 0xe72   :  { %2152 = vpow2.f32 %v1720_v5  ;;  %v2094_v5 = vpack.c.bf16 %v1576_v4, %v1575_v2 }
 0xe7b   :  { %v2151_v7 = vpop.eup %2150 }
 0xe7c   :  { %v2153_v8 = vpop.eup %2152  ;;  %v1195_v9 = vadd.f32 1.0, %v2151_v7  ;;  %v1577_v7 = vld [vmem:[%s2569_s9 + $0x30] sm:$0xff] }
 0xe7d   :  { %v1194_v10 = vadd.f32 1.0, %v2153_v8 }
 0xe7e   :  { %2154 = vrcp.f32 %v1195_v9 }
 0xe7f   :  { %2156 = vrcp.f32 %v1194_v10 }
 0xe88   :  { %v2155_v12 = vpop.eup %2154 }
 0xe89   :  { %v2157_v13 = vpop.eup %2156  ;;  %v1203_v58 = vmul.f32 %v2155_v12, %v1106_v62  ;;  %v1389_v11 = vsub.f32 1.0, %v2155_v12  ;;  %v1401_v47 = vmul.f32 %v2155_v12, %v2457_v59  ;;  %v1572_v59 = vld [vmem:[%s2569_s9 + $0x8] sm:$0xff]  ;;  %v1729_v12 = vld [vmem:[%s2570_s10] ss:$0 sm:$0xff] }
 0xe8a   :  { %v1202_v14 = vmul.f32 %v2157_v13, %v1104_v61  ;;  %v1388_v46 = vsub.f32 1.0, %v2157_v13  ;;  %v1400_v32 = vmul.f32 %v2157_v13, %v2459_v60  ;;  %v1497_v61 = vld [vmem:[%s2568_s8] sm:$0x3]  ;;  %v2088_v62 = vpack.c.bf16 %v1572_v59, %v1571_v30 }
 0xe8c   :  { %1945 = vmatprep.mubr.msk.f32.mxu0 %vm196_vm1, %v1202_v14 }
 0xe8d   :  { %1946 = vmatmul.mubr.msk.f32.vlgmr.msra.gmra.mrb[18].mxu0 %vm196_vm1, %v1203_v58 }
 0xf60   :  { %v1947_v15 = vpop.f32.mrb[18].mxu0 }
 0xf61   :  { %1289 = vrot.lane.b32.xlu0 %v1947_v15, %s2187_s3  ;;  %v1276_v16 = vpop.f32.mrb[19].mxu0 }
 0xf62   :  { %1287 = vrot.lane.b32.xlu1 %v1276_v16, %s2187_s3 }
 0xf65   :  { %1305 = vrot.lane.b32.xlu0 %v2347_v38, %s2187_s3 }
 0xfd3   :  { %v1290_v18 = vpop.permute.xlu0 %1289 }
 0xfd4   :  { %v1294_v19 = vadd.f32 %v1290_v18, %v2345_v36  ;;  %v1288_v20 = vpop.permute.xlu1 %1287 }
 0xfd5   :  { %v1293_v22 = vadd.f32 %v1288_v20, %v2347_v38  ;;  %v1405_v38 = vld [vmem:[%s2566_s6 + $0x8] sm:$0xff] }
 0xfd6   :  { %v2076_v33 = vpack.c.bf16 %v1405_v38, %v1404_v31 }
 0xfd7   :  { %v2121_v24 = vpack.i.bf16 %v1294_v19, %v1293_v22  ;;  %v1306_v40 = vpop.permute.xlu0 %1305 }
 0xfd8   :  { %2077 = vmatprep.subr.bf16.mxu0 %v2076_v33 }
 0xfd9   :  { %2122 = vrot.lane.b32.xlu1 %v2121_v24, %s2188_s14  ;;  %2079 = vmatpush3.bf16.msra.mxu0 %v2076_v33 }
 0xfdd   :  { %1307 = vrot.lane.b32.xlu1 %v2345_v36, %s2187_s3  ;;  %v1406_v36 = vld [vmem:[%s2566_s6 + $0x10] sm:$0xff] }
 0xfde   :  { %v2080_v37 = vpack.c.bf16 %v1407_v35, %v1406_v36 }
 0xfe0   :  { %2081 = vmatprep.subr.bf16.mxu0 %v2080_v37 }
 0xfe1   :  { %2083 = vmatpush3.bf16.msra.mxu0 %v2080_v37 }
0x104b   :  { %v2123_v25 = vpop.permute.xlu1 %2122 }
0x104c   :  { %v2125_v26 = vunpack.i.h.bf16 %v2123_v25  ;;  %v2124_v27 = vunpack.i.l.bf16 %v2123_v25 }
0x104e   :  { %v2072_v29 = vpack.c.bf16 %v2125_v26, %v2124_v27 }
0x104f   :  { %v1308_v39 = vpop.permute.xlu1 %1307 }
0x1050   :  { %2073 = vmatprep.subr.bf16.mxu1 %v2072_v29 }
0x1051   :  { %2075 = vmatpush3.bf16.msra.mxu1 %v2072_v29 }
0x1052   :  { %2084 = vmatprep.subr.bf16.mxu1 %v2190_v54 }
0x1054   :  { %1953 = vmatmul.mubr.msk.f32.vlgmr.msra.gmra.mrb[10].mxu1 %vm66_vm0, %v2369_v3 }
0x1055   :  { %1970 = vmatprep.mubr.msk.f32.mxu1 %vm2191_vm2, %v2186_v17 }
0x1127   :  { %v1954_v3 = vpop.f32.mrb[10].mxu1 }
0x1128   :  { %v1383_v41 = vadd.f32 %v1954_v3, %v1308_v39  ;;  %v1377_v42 = vpop.f32.mrb[11].mxu1 }
0x1129   :  { %v1378_v43 = vadd.f32 %v1377_v42, %v1306_v40 }
0x112a   :  { %v1387_v44 = vadd.f32 %v1947_v15, %v1383_v41 }
0x112b   :  { %v1386_v6 = vadd.f32 %v1378_v43, %v1276_v16 }
0x112c   :  { %1394 = vrot.lane.b32.xlu1 %v1387_v44, %s2188_s14 }
0x112d   :  { %1392 = vrot.lane.b32.xlu0 %v1386_v6, %s2188_s14 }
0x119e   :  { %v1395_v45 = vpop.permute.xlu1 %1394 }
0x119f   :  { %v1399_v34 = vmul.f32 %v1395_v45, %v1389_v11  ;;  %v1393_v48 = vpop.permute.xlu0 %1392 }
0x11a0   :  { %v1398_v49 = vmul.f32 %v1393_v48, %v1388_v46 }
0x11a1   :  { %v1403_v50 = vadd.f32 %v1401_v47, %v1399_v34 }
0x11a2   :  { %v1402_v51 = vadd.f32 %v1400_v32, %v1398_v49 }
0x11a3   :  { %1412 = vrot.lane.b32.xlu1 %v1403_v50, %s2189_s1 }
0x11a4   :  { %1410 = vrot.lane.b32.xlu0 %v1402_v51, %s2189_s1 }
0x1215   :  { %v1413_v53 = vpop.permute.xlu1 %1412 }
0x1216   :  { %v1411_v52 = vpop.permute.xlu0 %1410 }
0x1217   :  { %1963 = vmatprep.mubr.msk.f32.mxu0 %vm196_vm1, %v1411_v52 }
0x1218   :  { %1964 = vmatmul.mubr.msk.f32.vlgmr.msra.gmra.mrb[20].mxu0 %vm196_vm1, %v1413_v53 }
0x12eb   :  { %v1965_v21 = vpop.f32.mrb[20].mxu0 }
0x12ec   :  { %v1496_v57 = vmul.f32 %v1965_v21, %v1494_v55  ;;  %v1484_v28 = vpop.f32.mrb[21].mxu0 }
0x12ed   :  { %v1495_v23 = vmul.f32 %v1493_v56, %v1484_v28 }
0x12ef   :  { %v2085_v60 = vpack.c.bf16 %v1496_v57, %v1495_v23 }
0x12f1   :  { %2086 = vmatpush3.bf16.msra.mxu1 %v2085_v60 }
0x12f2   :  { %2087 = vmatprep.subr.bf16.mxu1 %v2190_v54 }
0x12f4   :  { %1971 = vmatmul.mubr.msk.f32.vlgmr.msra.gmra.mrb[12].mxu1 %vm66_vm0, %v1497_v61 }
0x12f5   :  { %2089 = vmatpush3.bf16.msra.mxu1 %v2088_v62  ;;  %1989 = vmatprep.mubr.msk.f32.mxu1 %vm2191_vm2, %v2186_v17  ;;  %v1578_v17 = vld [vmem:[%s2569_s9 + $0x38] sm:$0xff]  ;;  %s2192_s9 = smov [#allocation2]  }
0x12f6   :  { %2090 = vmatprep.subr.bf16.mxu1 %v2190_v54  ;;  %v2097_v8 = vpack.c.bf16 %v1578_v17, %v1577_v7  ;;  %s1679_s20 = sshll.u32 %s2192_s9, 4  ;;  %s1680_s20 = int_to_ptr.vmem [resolvable:$true] %s1679_s20 }
0x12f7   :  { %s2162_s10 = scalar_lea.vmem %s1680_s20, 32  ;;  %p2167_p1 = scmp.lt.s32.totalorder %s1680_s20, %s1680_s20 }
0x12f8   :  { %p2163_p0 = scmp.ne.s32.totalorder %s1680_s20, %s2162_s10  ;;  %p2168_p2 = scmp.lt.s32.totalorder %s2162_s10, %s2162_s10 }
0x12f9   :  { %2092 = vmatpush3.bf16.msra.mxu1 %v2091_v1 }
0x12fa   :  { %2093 = vmatprep.subr.bf16.mxu1 %v2190_v54  ;;  %p2169_p3 = por %p2168_p2, %p2167_p1 }
0x12fc   :  { %p2170_p4 = pnand %p2169_p3, %p2163_p0 }
0x12fd   :  { %2095 = vmatpush3.bf16.msra.mxu1 %v2094_v5 }
0x12fe   :  { %2096 = vmatprep.subr.bf16.mxu1 %v2190_v54 }
0x1301   :  { %2098 = vmatpush3.bf16.msra.mxu1 %v2097_v8 }
0x13c7   :  { %v1567_v9 = vpop.f32.mrb[12].mxu1 }
0x13c8   :  { %v1972_v10 = vpop.f32.mrb[13].mxu1  ;;  %1990 = vmatmul.mubr.msk.f32.vlgmr.msra.gmra.mrb[14].mxu1 %vm1586_vm3, %v1567_v9 }
0x149b   :  { %v1656_v13 = vpop.f32.mrb[14].mxu1 }
0x149c   :  { %v1657_v14 = vadd.f32 %v1729_v12, %v1656_v13  ;;  %v1991_v58 = vpop.f32.mrb[15].mxu1 }
0x149e   :  { %v1661_v15 = vsel %vm1660_vm4, %v1657_v14, -inf }
0x149f   :  { %1662 = vmax.xlane.f32.xlu0 %v1661_v15 }
0x152c   :  { %v1663_v16 = vpop.xlane.xlu0 %1662 }
0x152d   :  { %v1664_v18 = vsub.f32 %v1657_v14, %v1663_v16 }
0x152f   :  { %v1665_v19 = vmul.f32 1.442695, %v1664_v18 }
0x1531   :  { %2158 = vpow2.f32 %v1665_v19 }
0x153b   :  { %v2159_v20 = vpop.eup %2158 }
0x153c   :  { %v1667_v22 = vsel %vm1660_vm4, %v2159_v20, 0.0 }
0x153d   :  { %1668 = vadd.xlane.f32.xlu1 %v1667_v22 }
0x15ca   :  { %v1669_v24 = vpop.xlane.xlu1 %1668 }
0x15cb   :  { %2160 = vrcp.f32 %v1669_v24 }
0x15d5   :  { %v2161_v25 = vpop.eup %2160 }
0x15d6   :  { %v1671_v26 = vmul.f32 %v2161_v25, %v2159_v20 }
0x15d8   :  { %1672 = vst.msk [vmem:[#allocation2] sm:$0x3] %vm1660_vm4, %v1671_v26 }
0x15d9   :  { %2173 = shalt.err (!%p2170_p4)
}
0x15da   :  { %s2174_s23 = scalar_lea.hbm %s2571_s11, 32 }
0x15db   :  { %p2175_p5 = scmp.ne.s32.totalorder %s2571_s11, %s2174_s23  ;;  %p2178_p6 = scmp.lt.u32.totalorder %s2174_s23, %s2571_s11 }
0x15dd   :  { %p2180_p7 = pnand %p2178_p6, %p2175_p5 }
0x15df   :  { %2183 = shalt.err (!%p2180_p7)
}
0x15e0   :  { %1682 = dma.vmem_to_hbm [thread:$0]  %s1680_s20, 32, %s2571_s11, [#allocation3]  }
0x15e1   :  { %2184 = dma.done.wait [#allocation3], 32  }
0x15e2   :  { %2185 = vsyncadd [#allocation3], 4294967264 }
0x15e3   :  { %1686 = vsyncpa [#allocation3], 1 }

</bundles_post_ra>
